<compile_context>
chip_gen: v6e
topology: v6e:2x2x1
jax: 0.10.0
libtpu: 0.0.40
codegen_flags: <defaults>
</compile_context>

<pallas_src>
import functools

import jax
import jax.numpy as jnp
from jax.experimental import pallas as pl
from jax.experimental.pallas import tpu as pltpu


def _round_up(x, m):
    return ((x + m - 1) // m) * m


def _softplus(x):
    # numerically stable softplus, matches F.softplus / jax.nn.softplus
    return jnp.maximum(x, 0.0) + jnp.log1p(jnp.exp(-jnp.abs(x)))


def zinb_decoder_kernel(z_ref, w1_ref, b1_ref, w2_ref, b2_ref, out_ref):
    # decoder_net: Linear -> ReLU -> Linear  (MXU matmuls, f32 accumulate)
    h = jnp.dot(z_ref[...], w1_ref[...], preferred_element_type=jnp.float32)
    h = jnp.maximum(h + b1_ref[...], 0.0).astype(w2_ref.dtype)

    def head(k):
        # w2_ref[k]: (hidden_p, feature_tile); b2_ref[k]: (1, feature_tile)
        return (jnp.dot(h, w2_ref[k], preferred_element_type=jnp.float32)
                + b2_ref[k])

    mu_logits, theta_logits, pi_logits = head(0), head(1), head(2)

    mu = _softplus(mu_logits)
    theta = _softplus(theta_logits) + 1e-4
    pi = pl.reciprocal(1.0 + jnp.exp(-pi_logits), approx=False)        # sigmoid
    p = theta * pl.reciprocal(theta + mu, approx=False)
    p = jnp.clip(p, 1e-5, 1.0 - 1e-5)

    out_ref[0] = theta.astype(out_ref.dtype)   # r (total_count)
    out_ref[1] = p.astype(out_ref.dtype)       # NB success prob
    out_ref[2] = pi.astype(out_ref.dtype)      # zero-inflation prob


def zinb_decoder_forward(z, w1, b1, w2, b2, *, features,
                         batch_tile=None, feature_tile=None,
                         compute_dtype=jnp.float32, out_dtype=jnp.float32):
    """Returns (r, p, pi) — the parameters of Independent(ZINB(NB(r, p), pi), 1)."""
    z = jnp.asarray(z, jnp.float32)
    w1 = jnp.asarray(w1, jnp.float32)
    w2 = jnp.asarray(w2, jnp.float32)
    b1 = jnp.asarray(b1, jnp.float32).reshape(1, -1)
    b2 = jnp.asarray(b2, jnp.float32).reshape(-1)

    B, d_z = z.shape
    hidden = w1.shape[1]
    assert w1.shape[0] == d_z
    assert w2.shape == (hidden, 3 * features)
    assert b1.shape[1] == hidden and b2.shape[0] == 3 * features

    # --- tile selection ----------------------------------------------------
    if batch_tile is None:
        # Fill the MXU M dimension while keeping >=2 grid steps when the batch
        # allows it (so both v7x TensorCores get work).
        batch_tile = max(8, min(256, _round_up(B, 8) // 2))
        batch_tile = _round_up(batch_tile, 8)
    assert batch_tile % 8 == 0

    if feature_tile is None:
        if features % 128 == 0:
            feature_tile = min(features, 512)
            while features % feature_tile != 0:
                feature_tile -= 128
        else:
            feature_tile = features
    assert features % feature_tile == 0
    assert feature_tile % 128 == 0 or feature_tile == features

    # --- wrapper-side padding (free through ReLU / zero weights) -----------
    hidden_p = _round_up(hidden, 128)
    if hidden_p != hidden:
        w1 = jnp.pad(w1, ((0, 0), (0, hidden_p - hidden)))
        b1 = jnp.pad(b1, ((0, 0), (0, hidden_p - hidden)))
        w2 = jnp.pad(w2, ((0, hidden_p - hidden), (0, 0)))

    B_pad = _round_up(B, batch_tile)
    if B_pad != B:
        z = jnp.pad(z, ((0, B_pad - B), (0, 0)))

    # (hidden_p, 3*features) -> (3, hidden_p, features): chunk k lives at [k]
    w2r = w2.reshape(hidden_p, 3, features).transpose(1, 0, 2)
    b2r = b2.reshape(3, 1, features)

    if compute_dtype != jnp.float32:
        z = z.astype(compute_dtype)
        w1 = w1.astype(compute_dtype)
        w2r = w2r.astype(compute_dtype)

    grid = (B_pad // batch_tile, features // feature_tile)

    # --- explicit VMEM budget (double-buffered tiles + headroom) -----------
    cbytes = jnp.dtype(compute_dtype).itemsize
    obytes = jnp.dtype(out_dtype).itemsize
    est = 2 * (batch_tile * d_z * cbytes
               + d_z * hidden_p * cbytes
               + hidden_p * 4
               + 3 * hidden_p * feature_tile * cbytes
               + 3 * feature_tile * 4
               + 3 * batch_tile * feature_tile * obytes)
    vmem_limit = int(min(max(4 * est, 32 * 2 ** 20), 64 * 2 ** 20))

    out = pl.pallas_call(
        zinb_decoder_kernel,
        out_shape=jax.ShapeDtypeStruct((3, B_pad, features), out_dtype),
        grid=grid,
        in_specs=[
            pl.BlockSpec((batch_tile, d_z), lambda i, j: (i, 0)),              # z tile
            pl.BlockSpec((d_z, hidden_p), lambda i, j: (0, 0)),                # W1 (resident)
            pl.BlockSpec((1, hidden_p), lambda i, j: (0, 0)),                  # b1
            pl.BlockSpec((3, hidden_p, feature_tile), lambda i, j: (0, 0, j)),  # W2 block
            pl.BlockSpec((3, 1, feature_tile), lambda i, j: (0, 0, j)),        # b2 block
        ],
        out_specs=pl.BlockSpec((3, batch_tile, feature_tile),
                               lambda i, j: (0, i, j)),
        compiler_params=pltpu.CompilerParams(
            dimension_semantics=("parallel", "parallel"),
            vmem_limit_bytes=vmem_limit),
    )(z, w1, b1, w2r, b2r)

    r = out[0, :B]
    p = out[1, :B]
    pi = out[2, :B]
    return r, p, pi


def zinb_decoder_reference(z, w1, b1, w2, b2, features):
    """Pure-JAX reference of the same forward (for correctness check)."""
    h = jnp.maximum(z @ w1 + b1, 0.0)
    out = h @ w2 + b2
    mu_l = out[:, :features]
    th_l = out[:, features:2 * features]
    pi_l = out[:, 2 * features:]
    mu = jax.nn.softplus(mu_l)
    theta = jax.nn.softplus(th_l) + 1e-4
    pi = jax.nn.sigmoid(pi_l)
    p = jnp.clip(theta / (theta + mu), 1e-5, 1.0 - 1e-5)
    return theta, p, pi


if __name__ == "__main__":
    # Small, deterministic shapes consistent with the module:
    #   z: (batch, d_z); decoder_net output: (batch, 3*features)
    B, D_Z, HIDDEN, FEATURES = 128, 32, 64, 128

    key = jax.random.PRNGKey(0)
    k_z, k_w1, k_b1, k_w2, k_b2 = jax.random.split(key, 5)

    z = jax.random.normal(k_z, (B, D_Z), dtype=jnp.float32)
    # deterministic synthetic decoder_net parameters (Linear -> ReLU -> Linear)
    w1 = jax.random.normal(k_w1, (D_Z, HIDDEN), dtype=jnp.float32) * (1.0 / jnp.sqrt(D_Z))
    b1 = jax.random.normal(k_b1, (1, HIDDEN), dtype=jnp.float32) * 0.01
    w2 = jax.random.normal(k_w2, (HIDDEN, 3 * FEATURES), dtype=jnp.float32) * (1.0 / jnp.sqrt(HIDDEN))
    b2 = jax.random.normal(k_b2, (1, 3 * FEATURES), dtype=jnp.float32) * 0.01

    # f32 path (exact match to the reference within 1e-5)
    r, p, pi = zinb_decoder_forward(z, w1, b1, w2, b2, features=FEATURES)
    jax.block_until_ready((r, p, pi))

    r_ref, p_ref, pi_ref = zinb_decoder_reference(z, w1, b1, w2, b2, FEATURES)
    assert r.shape == (B, FEATURES) and p.shape == (B, FEATURES) and pi.shape == (B, FEATURES)
    assert jnp.allclose(r, r_ref, rtol=1e-5, atol=1e-5)
    assert jnp.allclose(p, p_ref, rtol=1e-5, atol=1e-5)
    assert jnp.allclose(pi, pi_ref, rtol=1e-5, atol=1e-5)

    # bf16 matmul fast path (halves weight/activation DMA, bf16-native MXU);
    # epilogue and outputs stay f32, so only matmul rounding differs.
    r16, p16, pi16 = zinb_decoder_forward(z, w1, b1, w2, b2, features=FEATURES,
                                          compute_dtype=jnp.bfloat16)
    jax.block_until_ready((r16, p16, pi16))
    assert jnp.allclose(r16, r_ref, rtol=1e-1, atol=1e-1)
    assert jnp.allclose(p16, p_ref, rtol=1e-1, atol=1e-1)
    assert jnp.allclose(pi16, pi_ref, rtol=1e-1, atol=1e-1)

    # TODO(synk): ZINB.log_prob / sample are distribution methods (not part of
    # forward); they would need lgamma + RNG kernels and are left out here.
    print("KERNEL_OK")
</pallas_src>

<mosaic_0001>
module attributes {stable_mosaic.version = 11 : i64} {
  func.func @zinb_decoder_kernel(%arg0: i32, %arg1: i32, %arg2: memref<64x32xf32, #tpu.memory_space<vmem>>, %arg3: memref<32x128xf32, #tpu.memory_space<vmem>>, %arg4: memref<1x128xf32, #tpu.memory_space<vmem>>, %arg5: memref<3x128x128xf32, #tpu.memory_space<vmem>>, %arg6: memref<3x1x128xf32, #tpu.memory_space<vmem>>, %arg7: memref<3x64x128xf32, #tpu.memory_space<vmem>>) attributes {dimension_semantics = [#tpu.dimension_semantics<parallel>, #tpu.dimension_semantics<parallel>], iteration_bounds = array<i64: 2, 1>, scalar_prefetch = 0 : i64, scratch_operands = 0 : i64, tpu.core_type = #tpu.core_type<tc>, window_params = [{transform_indices = @transform_0, window_bounds = array<i64: 64, 32>}, {pipeline_mode = #tpu.pipeline_mode<synchronous>, transform_indices = @transform_1, window_bounds = array<i64: 32, 128>}, {pipeline_mode = #tpu.pipeline_mode<synchronous>, transform_indices = @transform_2, window_bounds = array<i64: 1, 128>}, {transform_indices = @transform_3, window_bounds = array<i64: 3, 128, 128>}, {transform_indices = @transform_4, window_bounds = array<i64: 3, 1, 128>}, {transform_indices = @transform_5, window_bounds = array<i64: 3, 64, 128>}]} {
    %c0 = arith.constant 0 : index
    %c0_0 = arith.constant 0 : index
    %0 = vector.load %arg2[%c0, %c0_0] : memref<64x32xf32, #tpu.memory_space<vmem>>, vector<64x32xf32>
    %c0_1 = arith.constant 0 : index
    %c0_2 = arith.constant 0 : index
    %1 = vector.load %arg3[%c0_1, %c0_2] : memref<32x128xf32, #tpu.memory_space<vmem>>, vector<32x128xf32>
    %cst = arith.constant dense<0.000000e+00> : vector<64x128xf32>
    %2 = tpu.matmul %0, %1, %cst {dimension_numbers = #tpu.dot_dimension_numbers<[1], [0], [0], [1], [0, 0, 1, 1], [], []>} : vector<64x32xf32>, vector<32x128xf32>, vector<64x128xf32> -> vector<64x128xf32>
    %c0_3 = arith.constant 0 : index
    %c0_4 = arith.constant 0 : index
    %3 = vector.load %arg4[%c0_3, %c0_4] : memref<1x128xf32, #tpu.memory_space<vmem>>, vector<1x128xf32>
    %4 = vector.broadcast %3 : vector<1x128xf32> to vector<64x128xf32>
    %5 = arith.addf %2, %4 : vector<64x128xf32>
    %cst_5 = arith.constant 0.000000e+00 : f32
    %6 = vector.broadcast %cst_5 : f32 to vector<64x128xf32>
    %7 = arith.maximumf %5, %6 : vector<64x128xf32>
    %c0_6 = arith.constant 0 : index
    %c0_7 = arith.constant 0 : index
    %c0_8 = arith.constant 0 : index
    %8 = vector.load %arg5[%c0_6, %c0_7, %c0_8] : memref<3x128x128xf32, #tpu.memory_space<vmem>>, vector<1x128x128xf32>
    %9 = vector.shape_cast %8 : vector<1x128x128xf32> to vector<128x128xf32>
    %cst_9 = arith.constant dense<0.000000e+00> : vector<64x128xf32>
    %10 = tpu.matmul %7, %9, %cst_9 {dimension_numbers = #tpu.dot_dimension_numbers<[1], [0], [0], [1], [0, 0, 1, 1], [], []>} : vector<64x128xf32>, vector<128x128xf32>, vector<64x128xf32> -> vector<64x128xf32>
    %c0_10 = arith.constant 0 : index
    %c0_11 = arith.constant 0 : index
    %c0_12 = arith.constant 0 : index
    %11 = vector.load %arg6[%c0_10, %c0_11, %c0_12] : memref<3x1x128xf32, #tpu.memory_space<vmem>>, vector<1x1x128xf32>
    %12 = vector.shape_cast %11 : vector<1x1x128xf32> to vector<1x128xf32>
    %13 = vector.broadcast %12 : vector<1x128xf32> to vector<64x128xf32>
    %14 = arith.addf %10, %13 : vector<64x128xf32>
    %c1 = arith.constant 1 : index
    %c0_13 = arith.constant 0 : index
    %c0_14 = arith.constant 0 : index
    %15 = vector.load %arg5[%c1, %c0_13, %c0_14] : memref<3x128x128xf32, #tpu.memory_space<vmem>>, vector<1x128x128xf32>
    %16 = vector.shape_cast %15 : vector<1x128x128xf32> to vector<128x128xf32>
    %cst_15 = arith.constant dense<0.000000e+00> : vector<64x128xf32>
    %17 = tpu.matmul %7, %16, %cst_15 {dimension_numbers = #tpu.dot_dimension_numbers<[1], [0], [0], [1], [0, 0, 1, 1], [], []>} : vector<64x128xf32>, vector<128x128xf32>, vector<64x128xf32> -> vector<64x128xf32>
    %c1_16 = arith.constant 1 : index
    %c0_17 = arith.constant 0 : index
    %c0_18 = arith.constant 0 : index
    %18 = vector.load %arg6[%c1_16, %c0_17, %c0_18] : memref<3x1x128xf32, #tpu.memory_space<vmem>>, vector<1x1x128xf32>
    %19 = vector.shape_cast %18 : vector<1x1x128xf32> to vector<1x128xf32>
    %20 = vector.broadcast %19 : vector<1x128xf32> to vector<64x128xf32>
    %21 = arith.addf %17, %20 : vector<64x128xf32>
    %c2 = arith.constant 2 : index
    %c0_19 = arith.constant 0 : index
    %c0_20 = arith.constant 0 : index
    %22 = vector.load %arg5[%c2, %c0_19, %c0_20] : memref<3x128x128xf32, #tpu.memory_space<vmem>>, vector<1x128x128xf32>
    %23 = vector.shape_cast %22 : vector<1x128x128xf32> to vector<128x128xf32>
    %cst_21 = arith.constant dense<0.000000e+00> : vector<64x128xf32>
    %24 = tpu.matmul %7, %23, %cst_21 {dimension_numbers = #tpu.dot_dimension_numbers<[1], [0], [0], [1], [0, 0, 1, 1], [], []>} : vector<64x128xf32>, vector<128x128xf32>, vector<64x128xf32> -> vector<64x128xf32>
    %c2_22 = arith.constant 2 : index
    %c0_23 = arith.constant 0 : index
    %c0_24 = arith.constant 0 : index
    %25 = vector.load %arg6[%c2_22, %c0_23, %c0_24] : memref<3x1x128xf32, #tpu.memory_space<vmem>>, vector<1x1x128xf32>
    %26 = vector.shape_cast %25 : vector<1x1x128xf32> to vector<1x128xf32>
    %27 = vector.broadcast %26 : vector<1x128xf32> to vector<64x128xf32>
    %28 = arith.addf %24, %27 : vector<64x128xf32>
    %cst_25 = arith.constant 0.000000e+00 : f32
    %29 = vector.broadcast %cst_25 : f32 to vector<64x128xf32>
    %30 = arith.maximumf %14, %29 : vector<64x128xf32>
    %31 = math.absf %14 : vector<64x128xf32>
    %cst_26 = arith.constant 0.000000e+00 : f32
    %32 = vector.broadcast %cst_26 : f32 to vector<64x128xf32>
    %33 = arith.subf %32, %31 : vector<64x128xf32>
    %34 = math.exp %33 : vector<64x128xf32>
    %35 = math.log1p %34 : vector<64x128xf32>
    %36 = arith.addf %30, %35 : vector<64x128xf32>
    %cst_27 = arith.constant 0.000000e+00 : f32
    %37 = vector.broadcast %cst_27 : f32 to vector<64x128xf32>
    %38 = arith.maximumf %21, %37 : vector<64x128xf32>
    %39 = math.absf %21 : vector<64x128xf32>
    %cst_28 = arith.constant 0.000000e+00 : f32
    %40 = vector.broadcast %cst_28 : f32 to vector<64x128xf32>
    %41 = arith.subf %40, %39 : vector<64x128xf32>
    %42 = math.exp %41 : vector<64x128xf32>
    %43 = math.log1p %42 : vector<64x128xf32>
    %44 = arith.addf %38, %43 : vector<64x128xf32>
    %cst_29 = arith.constant 9.99999974E-5 : f32
    %45 = vector.broadcast %cst_29 : f32 to vector<64x128xf32>
    %46 = arith.addf %44, %45 : vector<64x128xf32>
    %cst_30 = arith.constant 0.000000e+00 : f32
    %47 = vector.broadcast %cst_30 : f32 to vector<64x128xf32>
    %48 = arith.subf %47, %28 : vector<64x128xf32>
    %49 = math.exp %48 : vector<64x128xf32>
    %cst_31 = arith.constant 1.000000e+00 : f32
    %50 = vector.broadcast %cst_31 : f32 to vector<64x128xf32>
    %51 = arith.addf %50, %49 : vector<64x128xf32>
    %52 = tpu.reciprocal %51 : vector<64x128xf32> -> vector<64x128xf32>
    %53 = arith.addf %46, %36 : vector<64x128xf32>
    %54 = tpu.reciprocal %53 : vector<64x128xf32> -> vector<64x128xf32>
    %55 = arith.mulf %46, %54 : vector<64x128xf32>
    %cst_32 = arith.constant 9.99999974E-6 : f32
    %cst_33 = arith.constant 0.999989986 : f32
    %56 = vector.broadcast %cst_32 : f32 to vector<64x128xf32>
    %57 = arith.maximumf %56, %55 : vector<64x128xf32>
    %58 = vector.broadcast %cst_33 : f32 to vector<64x128xf32>
    %59 = arith.minimumf %58, %57 : vector<64x128xf32>
    %c0_34 = arith.constant 0 : index
    %c0_35 = arith.constant 0 : index
    %c0_36 = arith.constant 0 : index
    %60 = vector.load %arg7[%c0_34, %c0_35, %c0_36] : memref<3x64x128xf32, #tpu.memory_space<vmem>>, vector<1x64x128xf32>
    %61 = vector.shape_cast %60 : vector<1x64x128xf32> to vector<64x128xf32>
    %62 = vector.shape_cast %46 : vector<64x128xf32> to vector<1x64x128xf32>
    tpu.vector_store %arg7[%c0_34, %c0_35, %c0_36], %62 {strides = array<i32>} : memref<3x64x128xf32, #tpu.memory_space<vmem>>, vector<1x64x128xf32>,
    %c1_37 = arith.constant 1 : index
    %c0_38 = arith.constant 0 : index
    %c0_39 = arith.constant 0 : index
    %63 = vector.load %arg7[%c1_37, %c0_38, %c0_39] : memref<3x64x128xf32, #tpu.memory_space<vmem>>, vector<1x64x128xf32>
    %64 = vector.shape_cast %63 : vector<1x64x128xf32> to vector<64x128xf32>
    %65 = vector.shape_cast %59 : vector<64x128xf32> to vector<1x64x128xf32>
    tpu.vector_store %arg7[%c1_37, %c0_38, %c0_39], %65 {strides = array<i32>} : memref<3x64x128xf32, #tpu.memory_space<vmem>>, vector<1x64x128xf32>,
    %c2_40 = arith.constant 2 : index
    %c0_41 = arith.constant 0 : index
    %c0_42 = arith.constant 0 : index
    %66 = vector.load %arg7[%c2_40, %c0_41, %c0_42] : memref<3x64x128xf32, #tpu.memory_space<vmem>>, vector<1x64x128xf32>
    %67 = vector.shape_cast %66 : vector<1x64x128xf32> to vector<64x128xf32>
    %68 = vector.shape_cast %52 : vector<64x128xf32> to vector<1x64x128xf32>
    tpu.vector_store %arg7[%c2_40, %c0_41, %c0_42], %68 {strides = array<i32>} : memref<3x64x128xf32, #tpu.memory_space<vmem>>, vector<1x64x128xf32>,
    return
  }
  func.func @transform_0(%arg0: i32, %arg1: i32) -> (i32, i32) {
    %c0_i32 = arith.constant 0 : i32
    %c0_i32_0 = arith.constant 0 : i32
    return %arg0, %c0_i32 : i32, i32
  }
  func.func @transform_1(%arg0: i32, %arg1: i32) -> (i32, i32) {
    %c0_i32 = arith.constant 0 : i32
    %c0_i32_0 = arith.constant 0 : i32
    %c0_i32_1 = arith.constant 0 : i32
    return %c0_i32, %c0_i32_0 : i32, i32
  }
  func.func @transform_2(%arg0: i32, %arg1: i32) -> (i32, i32) {
    %c0_i32 = arith.constant 0 : i32
    %c0_i32_0 = arith.constant 0 : i32
    %c0_i32_1 = arith.constant 0 : i32
    return %c0_i32, %c0_i32_0 : i32, i32
  }
  func.func @transform_3(%arg0: i32, %arg1: i32) -> (i32, i32, i32) {
    %c0_i32 = arith.constant 0 : i32
    %c0_i32_0 = arith.constant 0 : i32
    %c0_i32_1 = arith.constant 0 : i32
    return %c0_i32, %c0_i32_0, %arg1 : i32, i32, i32
  }
  func.func @transform_4(%arg0: i32, %arg1: i32) -> (i32, i32, i32) {
    %c0_i32 = arith.constant 0 : i32
    %c0_i32_0 = arith.constant 0 : i32
    %c0_i32_1 = arith.constant 0 : i32
    return %c0_i32, %c0_i32_0, %arg1 : i32, i32, i32
  }
  func.func @transform_5(%arg0: i32, %arg1: i32) -> (i32, i32, i32) {
    %c0_i32 = arith.constant 0 : i32
    %c0_i32_0 = arith.constant 0 : i32
    return %c0_i32, %arg0, %arg1 : i32, i32, i32
  }
}

</mosaic_0001>

<bundles_post_ra>
// kernel: tpu_custom_call.1
= control target key start
LH: loop header
LB: loop body
LE: loop exit
PB: predicated region body
PF: predicated region fallthrough
CT: control target
= control target key end

     0   :  { %10 = vsyncpa [#allocation3], 0  ;;  %s2440_s0 = inlined_call_operand.vmem [shape: f32[128,32], index: 0, kind: input, shape index: {}]   ;;  %s2441_s1 = inlined_call_operand.vmem [shape: f32[32,128], index: 1, kind: input, shape index: {}]   ;;  %s2442_s2 = inlined_call_operand.vmem [shape: f32[1,128], index: 2, kind: input, shape index: {}]   ;;  %s2443_s3 = inlined_call_operand.hbm [shape: f32[3,128,128], index: 3, kind: input, shape index: {}]   ;;  %s2444_s4 = inlined_call_operand.vmem [shape: f32[3,1,128], index: 4, kind: input, shape index: {}]   ;;  %s2445_s5 = inlined_call_operand.hbm [shape: f32[3,128,128], index: 5, kind: output, shape index: {}]  }
   0x1   :  { %11 = vsyncpa [#allocation4], 0 }
   0x2   :  { %13 = vsyncpa [#allocation4 + $0x1], 0  ;;  %s1938_s18 = smov 0   ;;  %s1940_s19 = smov 0  }
   0x3   :  { %s1942_s20 = smov 0   ;;  %s1944_s21 = smov 0  }
   0x4   :  { %s1946_s22 = smov 0   ;;  %s1948_s23 = smov 0  }
   0x5 LB: > { %s1311_s24 = sadd.s32 4294967295, %s1897_s23   ;;  %s1312_s25 = sadd.s32 4294967294, %s1897_s23   ;;  %s1897_s23 = sphi %s1948_s23, %s19_s23   ;;  %s1893_s22 = sphi %s1946_s22, %s2478_s22   ;;  %s1889_s21 = sphi %s1944_s21, %s2477_s21   ;;  %s1885_s20 = sphi %s1942_s20, %s2476_s20   ;;  %s1881_s19 = sphi %s1940_s19, %s2475_s19   ;;  %s1877_s18 = sphi %s1938_s18, %s2474_s18  }
   0x6   : > { %s31_s26 = sadd.s32 1, %s1893_s22  ;;  %s160_s27 = sadd.s32 1, %s1885_s20 }
   0x7   : > { %p33_p0 = scmp.ge.s32.totalorder %s31_s26, 2  ;;  %p170_p1 = scmp.ne.s32.totalorder %s1885_s20, %s1881_s19 }
   0x8   : > { %p171_p2 = scmp.eq.s32.totalorder %s1311_s24, 1  ;;  %p176_p3 = scmp.ne.s32.totalorder %s1881_s19, %s1877_s18 }
   0x9   : > { %s2480_s26 = smov (%p33_p0, %s31_s26), 0  ;;  %p177_p5 = scmp.eq.s32.totalorder %s1312_s25, 1 }
   0xa   : > { %p1978_p4 = por %p171_p2, %p170_p1  ;;  %s155_s29 = ssub.s32 %s1893_s22, %s2480_s26 }
   0xb   : > { %p1313_p6 = scmp.ge.s32.totalorder %s1897_s23, 1  ;;  %p158_p7 = scmp.eq.s32.totalorder %s155_s29, 0 }
   0xc   : > { %p1985_p8 = por %p177_p5, %p176_p3  ;;  %p184_p9 = scmp.lt.s32.totalorder %s1897_s23, 3 }
   0xd   : > { %s1991_s6 = scalar_select %p158_p7, %s1885_s20, %s160_s27  }
   0xe   : > { %p1993_p10 = pnand %p1313_p6, %p184_p9  ;;  %p1997_p11 = scmp.eq.s32.totalorder %s1311_s24, 0 }
   0xf   : > { %s1899_s9 = smov [#allocation2]  }
  0x10   : > { %p1637_p12 = pneg %p1993_p10  ;;  %s204_s10 = sshll.u32 %s1899_s9, 4  ;;  %s205_s10 = int_to_ptr.vmem [resolvable:$true] %s204_s10 }
  0x11   : > { %s1828_s11 = scalar_lea.vmem %s205_s10, 6144  ;;  %p1836_p5 = scmp.lt.s32.totalorder %s205_s10, %s205_s10 }
  0x12   : > { %p1638_p13 = pnand %p1997_p11, %p1637_p12  ;;  %p1829_p1 = scmp.ne.s32.totalorder %s205_s10, %s1828_s11 }
  0x13   : > { %p1837_p6 = scmp.lt.s32.totalorder %s1828_s11, %s1828_s11 }
  0x14   : > { %p1819_p0 = pneg %p1638_p13 }
  0x15   : > { %p1838_p7 = por %p1837_p6, %p1836_p5 }
  0x16   : > { %p1831_p2 = pnand %p1829_p1, %p1819_p0 }
  0x18   : > { %p1832_p3 = pneg %p1831_p2 }
  0x1a   : > { %p1839_p9 = pnand %p1838_p7, %p1832_p3 }
  0x1c   : > { %1842 = shalt.err (!%p1839_p9)
}
  0x1d   : > { %s1900_s12 = smov 128   ;;  %s1901_s13 = smov 8  }
  0x1e   : > { %1640 = dma.hbm_to_vmem [thread:$0]  (!%p1638_p13), %s2443_s3, 6144, %s205_s10, [#allocation3], %s1900_s12, %s1900_s12, %s1901_s13  }
  0x1f   : > { %235 = sbr.rel (%p1993_p10) target bundleno = 572 (0x23c), region = 40 }
  0x24   : > { %1868 = dma.done.wait (%p1997_p11), [#allocation3], 6144  }
  0x25   : > { %1870 = vsyncadd (%p1997_p11), [#allocation3], 4294961152  ;;  %s1319_s16 = sshll.u32 %s1889_s21, 3  ;;  %vm295_vm0 = vcmask 261120   ;;  %v287_v0 = vld [vmem:[%s2441_s1 + $0x18] sm:$0xff]  ;;  %v286_v1 = vld [vmem:[%s2441_s1 + $0x10] sm:$0xff] }
  0x26   : > { %p267_p12 = scmp.lt.s32.totalorder %s1319_s16, 15  ;;  %1440 = vmatprep.subr.mxu0 %v287_v0  ;;  %v285_v3 = vld [vmem:[%s2441_s1 + $0x8] sm:$0xff]  ;;  %v284_v4 = vld [vmem:[%s2441_s1] sm:$0xff]  ;;  %v448_v5 = vld [vmem:[#allocation2 + $0x78] sm:$0xff] }
  0x27   : > { %1441 = vmatpush3.msra.mxu0 %v287_v0  ;;  %v447_v6 = vld [vmem:[#allocation2 + $0x70] sm:$0xff]  ;;  %1460 = vmatprep.subr.mxu1 %v448_v5  ;;  %v577_v8 = vld [vmem:[#allocation2 + $0xf8] sm:$0xff]  ;;  %v446_v11 = vld [vmem:[#allocation2 + $0x68] sm:$0xff] }
  0x28   : > { %s2482_s16 = smov (!%p267_p12, %s1319_s16), 15  ;;  %1442 = vmatprep.subr.mxu0 %v286_v1  ;;  %1461 = vmatpush3.msra.mxu1 %v448_v5  ;;  %v576_v10 = vld [vmem:[#allocation2 + $0xf0] sm:$0xff]  ;;  %v575_v13 = vld [vmem:[#allocation2 + $0xe8] sm:$0xff]  ;;  %v445_v15 = vld [vmem:[#allocation2 + $0x60] sm:$0xff] }
  0x29   : > { %s1320_s17 = sshll.u32 %s2482_s16, 3  ;;  %1443 = vmatpush3.msra.mxu0 %v286_v1  ;;  %1462 = vmatprep.subr.mxu1 %v447_v6  ;;  %v574_v16 = vld [vmem:[#allocation2 + $0xe0] sm:$0xff]  ;;  %v444_v18 = vld [vmem:[#allocation2 + $0x58] sm:$0xff]  ;;  %v443_v21 = vld [vmem:[#allocation2 + $0x50] sm:$0xff]  ;;  %s263_s16 = sand.u32 1, %s1881_s19  }
  0x2a   : > { %s2018_s27 = scalar_lea.vmem %s2440_s0, %s1320_s17  ;;  %1444 = vmatprep.subr.mxu0 %v285_v3  ;;  %1463 = vmatpush3.msra.mxu1 %v447_v6  ;;  %v573_v20 = vld [vmem:[#allocation2 + $0xd8] sm:$0xff]  ;;  %v572_v22 = vld [vmem:[#allocation2 + $0xd0] sm:$0xff]  ;;  %v442_v24 = vld [vmem:[#allocation2 + $0x48] sm:$0xff]  ;;  %s2195_s29 = smul.u32 192, %s263_s16 }
  0x2b   : > { %v276_v2 = vld [vmem:[%s2018_s27] sm:$0xff]  ;;  %1445 = vmatpush3.msra.mxu0 %v285_v3  ;;  %v277_v7 = vld [vmem:[%s2018_s27 + $0x8] sm:$0xff]  ;;  %v278_v9 = vld [vmem:[%s2018_s27 + $0x10] sm:$0xff]  ;;  %1464 = vmatprep.subr.mxu1 %v446_v11  ;;  %s1176_s10 = scalar_lea.sflag [#allocation4], %s263_s16 }
  0x2c   : > { %1448 = vmatprep.mubr.msk.f32.mxu0 %vm295_vm0, %v276_v2  ;;  %1446 = vmatprep.subr.mxu0 %v284_v4  ;;  %v279_v12 = vld [vmem:[%s2018_s27 + $0x18] sm:$0xff]  ;;  %v280_v14 = vld [vmem:[%s2018_s27 + $0x20] sm:$0xff]  ;;  %v281_v17 = vld [vmem:[%s2018_s27 + $0x28] sm:$0xff]  ;;  %s2237_s7 = scalar_lea.vmem [#allocation5], %s2195_s29 }
  0x2d   : > { %1447 = vmatpush3.msra.mxu0 %v284_v4  ;;  %1465 = vmatpush3.msra.mxu1 %v446_v11  ;;  %v282_v19 = vld [vmem:[%s2018_s27 + $0x30] sm:$0xff]  ;;  %v283_v23 = vld [vmem:[%s2018_s27 + $0x38] sm:$0xff]  ;;  %v571_v25 = vld [vmem:[#allocation2 + $0xc8] sm:$0xff] }
  0x2e   : > { %1449 = vmatmul.mubr.msk.f32.vlgmr.msra.gmra.mxu0 %vm295_vm0, %v277_v7  ;;  %1504 = vmatprep.subr.mxu0 %v577_v8  ;;  %v441_v26 = vld [vmem:[#allocation2 + $0x40] sm:$0xff]  ;;  %v440_v28 = vld [vmem:[#allocation2 + $0x38] sm:$0xff]  ;;  %v439_v30 = vld [vmem:[#allocation2 + $0x30] sm:$0xff] }
  0x2f   : > { %1451 = vmatprep.mubr.msk.f32.mxu0 %vm295_vm0, %v278_v9  ;;  %1505 = vmatpush3.msra.mxu0 %v577_v8  ;;  %v570_v27 = vld [vmem:[#allocation2 + $0xc0] sm:$0xff]  ;;  %v569_v29 = vld [vmem:[#allocation2 + $0xb8] sm:$0xff]  ;;  %v568_v31 = vld [vmem:[#allocation2 + $0xb0] sm:$0xff] }
  0x30   : > { %1506 = vmatprep.subr.mxu0 %v576_v10  ;;  %1466 = vmatprep.subr.mxu1 %v445_v15  ;;  %v438_v32 = vld [vmem:[#allocation2 + $0x28] sm:$0xff]  ;;  %v437_v34 = vld [vmem:[#allocation2 + $0x20] sm:$0xff]  ;;  %v436_v36 = vld [vmem:[#allocation2 + $0x18] sm:$0xff] }
  0x31   : > { %1507 = vmatpush3.msra.mxu0 %v576_v10  ;;  %1467 = vmatpush3.msra.mxu1 %v445_v15  ;;  %v567_v33 = vld [vmem:[#allocation2 + $0xa8] sm:$0xff]  ;;  %v566_v35 = vld [vmem:[#allocation2 + $0xa0] sm:$0xff]  ;;  %v565_v37 = vld [vmem:[#allocation2 + $0x98] sm:$0xff] }
  0x32   : > { %1452 = vmatmul.mubr.msk.f32.gmra.mxu0 %vm295_vm0, %v279_v12  ;;  %1508 = vmatprep.subr.mxu0 %v575_v13  ;;  %v435_v38 = vld [vmem:[#allocation2 + $0x10] sm:$0xff]  ;;  %v434_v40 = vld [vmem:[#allocation2 + $0x8] sm:$0xff]  ;;  %v433_v42 = vld [vmem:[#allocation2] sm:$0xff] }
  0x33   : > { %1454 = vmatprep.mubr.msk.f32.mxu0 %vm295_vm0, %v280_v14  ;;  %1509 = vmatpush3.msra.mxu0 %v575_v13  ;;  %v564_v39 = vld [vmem:[#allocation2 + $0x90] sm:$0xff]  ;;  %v563_v41 = vld [vmem:[#allocation2 + $0x88] sm:$0xff]  ;;  %v562_v43 = vld [vmem:[#allocation2 + $0x80] sm:$0xff] }
  0x34   : > { %1510 = vmatprep.subr.mxu0 %v574_v16  ;;  %1468 = vmatprep.subr.mxu1 %v444_v18  ;;  %v707_v44 = vld [vmem:[#allocation2 + $0x178] sm:$0xff]  ;;  %v1321_v45 = vld [vmem:[%s2442_s2] ss:$0 sm:$0xff]  ;;  %v706_v55 = vld [vmem:[#allocation2 + $0x170] sm:$0xff] }
  0x35   : > { %1511 = vmatpush3.msra.mxu0 %v574_v16  ;;  %1469 = vmatpush3.msra.mxu1 %v444_v18  ;;  %v705_v60 = vld [vmem:[#allocation2 + $0x168] sm:$0xff]  ;;  %v704_v0 = vld [vmem:[#allocation2 + $0x160] sm:$0xff]  ;;  %v703_v5 = vld [vmem:[#allocation2 + $0x158] sm:$0xff] }
  0x36   : > { %1455 = vmatmul.mubr.msk.f32.gmra.mxu0 %vm295_vm0, %v281_v17  ;;  %1512 = vmatprep.subr.mxu0 %v573_v20  ;;  %v702_v7 = vld [vmem:[#allocation2 + $0x150] sm:$0xff]  ;;  %v701_v10 = vld [vmem:[#allocation2 + $0x148] sm:$0xff]  ;;  %v700_v12 = vld [vmem:[#allocation2 + $0x140] sm:$0xff] }
  0x37   : > { %1457 = vmatprep.mubr.msk.f32.mxu0 %vm295_vm0, %v282_v19  ;;  %1513 = vmatpush3.msra.mxu0 %v573_v20  ;;  %v699_v13 = vld [vmem:[#allocation2 + $0x138] sm:$0xff]  ;;  %v698_v14 = vld [vmem:[#allocation2 + $0x130] sm:$0xff]  ;;  %v697_v15 = vld [vmem:[#allocation2 + $0x128] sm:$0xff] }
  0x38   : > { %1470 = vmatprep.subr.mxu1 %v443_v21  ;;  %1514 = vmatprep.subr.mxu0 %v572_v22  ;;  %v696_v16 = vld [vmem:[#allocation2 + $0x120] sm:$0xff]  ;;  %v695_v17 = vld [vmem:[#allocation2 + $0x118] sm:$0xff]  ;;  %v694_v18 = vld [vmem:[#allocation2 + $0x110] sm:$0xff] }
  0x39   : > { %1471 = vmatpush3.msra.mxu1 %v443_v21  ;;  %1515 = vmatpush3.msra.mxu0 %v572_v22  ;;  %v693_v19 = vld [vmem:[#allocation2 + $0x108] sm:$0xff]  ;;  %v692_v20 = vld [vmem:[#allocation2 + $0x100] sm:$0xff] }
  0x3a   : > { %1458 = vmatmul.mubr.msk.f32.gmra.mxu0 %vm295_vm0, %v283_v23  ;;  %1472 = vmatprep.subr.mxu1 %v442_v24  ;;  %v2085_v21 = vld [vmem:[%s2444_s4] ss:$0 sm:$0xff]  ;;  %v2090_v22 = vld [vmem:[%s2444_s4 + $0x1] ss:$0 sm:$0xff] }
  0x3b   : > { %1516 = vmatprep.subr.mxu0 %v571_v25  ;;  %1473 = vmatpush3.msra.mxu1 %v442_v24 }
  0x3c   : > { %1517 = vmatpush3.msra.mxu0 %v571_v25  ;;  %1474 = vmatprep.subr.mxu1 %v441_v26 }
  0x3d   : > { %1518 = vmatprep.subr.mxu0 %v570_v27  ;;  %1475 = vmatpush3.msra.mxu1 %v441_v26 }
  0x3e   : > { %1519 = vmatpush3.msra.mxu0 %v570_v27  ;;  %1476 = vmatprep.subr.mxu1 %v440_v28 }
  0x3f   : > { %1520 = vmatprep.subr.mxu0 %v569_v29  ;;  %1477 = vmatpush3.msra.mxu1 %v440_v28 }
  0x40   : > { %1521 = vmatpush3.msra.mxu0 %v569_v29  ;;  %1478 = vmatprep.subr.mxu1 %v439_v30 }
  0x41   : > { %1522 = vmatprep.subr.mxu0 %v568_v31  ;;  %1479 = vmatpush3.msra.mxu1 %v439_v30 }
  0x42   : > { %1523 = vmatpush3.msra.mxu0 %v568_v31  ;;  %1480 = vmatprep.subr.mxu1 %v438_v32 }
  0x43   : > { %1524 = vmatprep.subr.mxu0 %v567_v33  ;;  %1481 = vmatpush3.msra.mxu1 %v438_v32 }
  0x44   : > { %1525 = vmatpush3.msra.mxu0 %v567_v33  ;;  %1482 = vmatprep.subr.mxu1 %v437_v34 }
  0x45   : > { %1526 = vmatprep.subr.mxu0 %v566_v35  ;;  %1483 = vmatpush3.msra.mxu1 %v437_v34 }
  0x46   : > { %1527 = vmatpush3.msra.mxu0 %v566_v35  ;;  %1484 = vmatprep.subr.mxu1 %v436_v36 }
  0x47   : > { %1528 = vmatprep.subr.mxu0 %v565_v37  ;;  %1485 = vmatpush3.msra.mxu1 %v436_v36 }
  0x48   : > { %1529 = vmatpush3.msra.mxu0 %v565_v37  ;;  %1486 = vmatprep.subr.mxu1 %v435_v38 }
  0x49   : > { %1530 = vmatprep.subr.mxu0 %v564_v39  ;;  %1487 = vmatpush3.msra.mxu1 %v435_v38 }
  0x4a   : > { %1531 = vmatpush3.msra.mxu0 %v564_v39  ;;  %1488 = vmatprep.subr.mxu1 %v434_v40 }
  0x4b   : > { %1532 = vmatprep.subr.mxu0 %v563_v41  ;;  %1489 = vmatpush3.msra.mxu1 %v434_v40 }
  0x4c   : > { %1533 = vmatpush3.msra.mxu0 %v563_v41  ;;  %1490 = vmatprep.subr.mxu1 %v433_v42 }
  0x4d   : > { %1534 = vmatprep.subr.mxu0 %v562_v43  ;;  %1491 = vmatpush3.msra.mxu1 %v433_v42 }
  0x4e   : > { %1535 = vmatpush3.msra.mxu0 %v562_v43  ;;  %1592 = vmatprep.subr.mxu1 %v707_v44 }
  0x4f   : > { %1548 = vmatprep.subr.mxu0 %v707_v44 }
  0xee   : > { %v1450_v46 = vpop.f32.mrf.mxu0 }
  0xef   : > { %v392_v47 = vadd.f32 %v1450_v46, %v1321_v45 }
  0xf0   : > { %v386_v48 = vpop.f32.mrf.mxu0 }
  0xf1   : > { %v387_v49 = vadd.f32 %v1321_v45, %v386_v48  ;;  %v2053_v52 = vmax.f32 %v392_v47, 0.0 }
  0xf2   : > { %v1453_v50 = vpop.f32.mrf.mxu0 }
  0xf3   : > { %v2051_v51 = vmax.f32 %v387_v49, 0.0  ;;  %v402_v56 = vadd.f32 %v1453_v50, %v1321_v45 }
  0xf4   : > { %v396_v53 = vpop.f32.mrf.mxu0 }
  0xf5   : > { %v397_v54 = vadd.f32 %v1321_v45, %v396_v53  ;;  %1492 = vmatprep.mubr.f32.mxu1 %v2051_v51  ;;  %1536 = vmatprep.mubr.f32.mxu0 %v2051_v51  ;;  %v2059_v62 = vmax.f32 %v402_v56, 0.0 }
  0xf6   : > { %v1456_v57 = vpop.f32.mrf.mxu0  ;;  %1493 = vmatmul.mubr.f32.vlgmr.msra.gmra.mxu1 %v2053_v52  ;;  %1537 = vmatmul.mubr.f32.vlgmr.msra.gmra.mxu0 %v2053_v52 }
  0xf7   : > { %v427_v58 = vmax.f32 %v397_v54, 0.0  ;;  %1549 = vmatpush3.msra.mxu0 %v707_v44  ;;  %1608 = vmatpush3.msra.mxu1 %v707_v44  ;;  %v412_v1 = vadd.f32 %v1456_v57, %v1321_v45 }
  0xf8   : > { %1550 = vmatprep.subr.mxu0 %v706_v55  ;;  %1593 = vmatprep.subr.mxu1 %v706_v55  ;;  %v406_v59 = vpop.f32.mrf.mxu0 }
  0xf9   : > { %v407_v61 = vadd.f32 %v1321_v45, %v406_v59  ;;  %1551 = vmatpush3.msra.mxu0 %v706_v55  ;;  %1609 = vmatpush3.msra.mxu1 %v706_v55  ;;  %v2065_v6 = vmax.f32 %v412_v1, 0.0 }
  0xfa   : > { %1495 = vmatprep.mubr.f32.mxu1 %v427_v58  ;;  %1539 = vmatprep.mubr.f32.mxu0 %v427_v58  ;;  %v1459_v63 = vpop.f32.mrf.mxu0 }
  0xfb   : > { %1552 = vmatprep.subr.mxu0 %v705_v60  ;;  %1594 = vmatprep.subr.mxu1 %v705_v60  ;;  %v2061_v2 = vmax.f32 %v407_v61, 0.0  ;;  %v422_v8 = vadd.f32 %v1459_v63, %v1321_v45 }
  0xfc   : > { %1496 = vmatmul.mubr.f32.gmra.mxu1 %v2059_v62  ;;  %1540 = vmatmul.mubr.f32.gmra.mxu0 %v2059_v62  ;;  %v416_v3 = vpop.f32.mrf.mxu0 }
  0xfd   : > { %1553 = vmatpush3.msra.mxu0 %v705_v60  ;;  %1610 = vmatpush3.msra.mxu1 %v705_v60  ;;  %v417_v4 = vadd.f32 %v1321_v45, %v416_v3  ;;  %v432_v11 = vmax.f32 %v422_v8, 0.0 }
  0xfe   : > { %1554 = vmatprep.subr.mxu0 %v704_v0  ;;  %1595 = vmatprep.subr.mxu1 %v704_v0 }
  0xff   : > { %1555 = vmatpush3.msra.mxu0 %v704_v0  ;;  %1611 = vmatpush3.msra.mxu1 %v704_v0  ;;  %v2069_v9 = vmax.f32 %v417_v4, 0.0 }
 0x100   : > { %1498 = vmatprep.mubr.f32.mxu1 %v2061_v2  ;;  %1542 = vmatprep.mubr.f32.mxu0 %v2061_v2 }
 0x101   : > { %1556 = vmatprep.subr.mxu0 %v703_v5  ;;  %1596 = vmatprep.subr.mxu1 %v703_v5 }
 0x102   : > { %1499 = vmatmul.mubr.f32.gmra.mxu1 %v2065_v6  ;;  %1543 = vmatmul.mubr.f32.gmra.mxu0 %v2065_v6 }
 0x103   : > { %1557 = vmatpush3.msra.mxu0 %v703_v5  ;;  %1612 = vmatpush3.msra.mxu1 %v703_v5 }
 0x104   : > { %1558 = vmatprep.subr.mxu0 %v702_v7  ;;  %1597 = vmatprep.subr.mxu1 %v702_v7 }
 0x105   : > { %1559 = vmatpush3.msra.mxu0 %v702_v7  ;;  %1613 = vmatpush3.msra.mxu1 %v702_v7 }
 0x106   : > { %1501 = vmatprep.mubr.f32.mxu1 %v2069_v9  ;;  %1545 = vmatprep.mubr.f32.mxu0 %v2069_v9 }
 0x107   : > { %1560 = vmatprep.subr.mxu0 %v701_v10  ;;  %1598 = vmatprep.subr.mxu1 %v701_v10 }
 0x108   : > { %1502 = vmatmul.mubr.f32.gmra.mxu1 %v432_v11  ;;  %1546 = vmatmul.mubr.f32.gmra.mxu0 %v432_v11 }
 0x109   : > { %1561 = vmatpush3.msra.mxu0 %v701_v10  ;;  %1614 = vmatpush3.msra.mxu1 %v701_v10 }
 0x10a   : > { %1562 = vmatprep.subr.mxu0 %v700_v12  ;;  %1599 = vmatprep.subr.mxu1 %v700_v12 }
 0x10b   : > { %1580 = vmatprep.mubr.f32.mxu0 %v2051_v51  ;;  %1583 = vmatprep.mubr.f32.mxu1 %v427_v58 }
 0x10c   : > { %1563 = vmatpush3.msra.mxu0 %v700_v12  ;;  %1615 = vmatpush3.msra.mxu1 %v700_v12 }
 0x10d   : > { %1564 = vmatprep.subr.mxu0 %v699_v13  ;;  %1600 = vmatprep.subr.mxu1 %v699_v13 }
 0x10e   : > { %1565 = vmatpush3.msra.mxu0 %v699_v13  ;;  %1616 = vmatpush3.msra.mxu1 %v699_v13 }
 0x10f   : > { %1566 = vmatprep.subr.mxu0 %v698_v14  ;;  %1601 = vmatprep.subr.mxu1 %v698_v14 }
 0x110   : > { %1567 = vmatpush3.msra.mxu0 %v698_v14  ;;  %1617 = vmatpush3.msra.mxu1 %v698_v14 }
 0x111   : > { %1568 = vmatprep.subr.mxu0 %v697_v15  ;;  %1602 = vmatprep.subr.mxu1 %v697_v15 }
 0x112   : > { %1569 = vmatpush3.msra.mxu0 %v697_v15  ;;  %1618 = vmatpush3.msra.mxu1 %v697_v15 }
 0x113   : > { %1570 = vmatprep.subr.mxu0 %v696_v16  ;;  %1603 = vmatprep.subr.mxu1 %v696_v16 }
 0x114   : > { %1571 = vmatpush3.msra.mxu0 %v696_v16  ;;  %1619 = vmatpush3.msra.mxu1 %v696_v16 }
 0x115   : > { %1572 = vmatprep.subr.mxu0 %v695_v17  ;;  %1604 = vmatprep.subr.mxu1 %v695_v17 }
 0x116   : > { %1573 = vmatpush3.msra.mxu0 %v695_v17  ;;  %1620 = vmatpush3.msra.mxu1 %v695_v17 }
 0x117   : > { %1574 = vmatprep.subr.mxu0 %v694_v18  ;;  %1605 = vmatprep.subr.mxu1 %v694_v18 }
 0x118   : > { %1575 = vmatpush3.msra.mxu0 %v694_v18  ;;  %1621 = vmatpush3.msra.mxu1 %v694_v18 }
 0x119   : > { %1576 = vmatprep.subr.mxu0 %v693_v19  ;;  %1606 = vmatprep.subr.mxu1 %v693_v19 }
 0x11a   : > { %1577 = vmatpush3.msra.mxu0 %v693_v19  ;;  %1622 = vmatpush3.msra.mxu1 %v693_v19 }
 0x11b   : > { %1578 = vmatprep.subr.mxu0 %v692_v20  ;;  %1607 = vmatprep.subr.mxu1 %v692_v20 }
 0x11c   : > { %1579 = vmatpush3.msra.mxu0 %v692_v20  ;;  %1623 = vmatpush3.msra.mxu1 %v692_v20 }
 0x11d   : > { %1581 = vmatmul.mubr.f32.vlgmr.msra.gmra.mxu0 %v2053_v52  ;;  %1584 = vmatmul.mubr.f32.vlgmr.msra.gmra.mxu1 %v2059_v62 }
 0x11e   : > { %1586 = vmatprep.mubr.f32.mxu1 %v2061_v2 }
 0x121   : > { %1587 = vmatmul.mubr.f32.gmra.mxu1 %v2065_v6 }
 0x122   : > { %1589 = vmatprep.mubr.f32.mxu1 %v2069_v9 }
 0x125   : > { %1590 = vmatmul.mubr.f32.gmra.mxu1 %v432_v11 }
 0x1b6   : > { %v1494_v23 = vpop.f32.mrf.mxu1  ;;  %v1538_v24 = vpop.f32.mrf.mxu0 }
 0x1b7   : > { %v2093_v25 = vadd.f32 %v1494_v23, %v2085_v21  ;;  %v2096_v26 = vadd.f32 %v1538_v24, %v2090_v22 }
 0x1b8   : > { %v522_v27 = vpop.f32.mrf.mxu1  ;;  %v652_v28 = vpop.f32.mrf.mxu0 }
 0x1b9   : > { %v830_v29 = vand.u32 2147483647, %v2093_v25  ;;  %v950_v30 = vand.u32 2147483647, %v2096_v26  ;;  %v2101_v31 = vadd.f32 %v2085_v21, %v522_v27  ;;  %v2104_v32 = vadd.f32 %v2090_v22, %v652_v28 }
 0x1ba   : > { %v822_v15 = vmax.f32 %v2093_v25, 0.0  ;;  %v942_v16 = vmax.f32 %v2096_v26, 0.0 }
 0x1bb   : > { %v838_v33 = vsub.f32 0.0, %v830_v29  ;;  %v958_v34 = vsub.f32 0.0, %v950_v30  ;;  %v829_v35 = vand.u32 2147483647, %v2101_v31  ;;  %v949_v36 = vand.u32 2147483647, %v2104_v32 }
 0x1bc   : > { %v1497_v37 = vpop.f32.mrf.mxu1  ;;  %v1541_v38 = vpop.f32.mrf.mxu0  ;;  %v821_v24 = vmax.f32 %v2101_v31, 0.0  ;;  %v941_v29 = vmax.f32 %v2104_v32, 0.0 }
 0x1bd   : > { %v847_v39 = vmul.f32 1.442695, %v838_v33  ;;  %v967_v40 = vmul.f32 1.442695, %v958_v34  ;;  %v2109_v41 = vadd.f32 %v1497_v37, %v2085_v21  ;;  %v2112_v42 = vadd.f32 %v1541_v38, %v2090_v22 }
 0x1be   : > { %v837_v43 = vsub.f32 0.0, %v829_v35  ;;  %v957_v44 = vsub.f32 0.0, %v949_v36  ;;  %v532_v45 = vpop.f32.mrf.mxu1  ;;  %v662_v46 = vpop.f32.mrf.mxu0 }
 0x1bf   : > { %1705 = vpow2.f32 %v847_v39  ;;  %v832_v47 = vand.u32 2147483647, %v2109_v41  ;;  %v952_v50 = vand.u32 2147483647, %v2112_v42  ;;  %v2117_v52 = vadd.f32 %v2085_v21, %v532_v45 }
 0x1c0   : > { %1707 = vpow2.f32 %v967_v40  ;;  %v845_v48 = vmul.f32 1.442695, %v837_v43  ;;  %v965_v49 = vmul.f32 1.442695, %v957_v44  ;;  %v2120_v53 = vadd.f32 %v2090_v22, %v662_v46 }
 0x1c1   : > { %v840_v51 = vsub.f32 0.0, %v832_v47  ;;  %v960_v54 = vsub.f32 0.0, %v952_v50  ;;  %v831_v58 = vand.u32 2147483647, %v2117_v52  ;;  %v824_v30 = vmax.f32 %v2109_v41, 0.0 }
 0x1c2   : > { %1709 = vpow2.f32 %v845_v48  ;;  %v1500_v55 = vpop.f32.mrf.mxu1  ;;  %v1544_v56 = vpop.f32.mrf.mxu0  ;;  %v951_v60 = vand.u32 2147483647, %v2120_v53  ;;  %v944_v34 = vmax.f32 %v2112_v42, 0.0  ;;  %v943_v45 = vmax.f32 %v2120_v53, 0.0 }
 0x1c3   : > { %1711 = vpow2.f32 %v965_v49  ;;  %v851_v57 = vmul.f32 1.442695, %v840_v51  ;;  %v971_v59 = vmul.f32 1.442695, %v960_v54  ;;  %v2125_v61 = vadd.f32 %v1500_v55, %v2085_v21 }
 0x1c4   : > { %v542_v62 = vpop.f32.mrf.mxu1  ;;  %v839_v63 = vsub.f32 0.0, %v831_v58  ;;  %v2128_v0 = vadd.f32 %v1544_v56, %v2090_v22  ;;  %v959_v2 = vsub.f32 0.0, %v951_v60  ;;  %v672_v9 = vpop.f32.mrf.mxu0 }
 0x1c5   : > { %1713 = vpow2.f32 %v851_v57  ;;  %v2131_v1 = vadd.f32 %v2085_v21, %v542_v62  ;;  %v834_v3 = vand.u32 2147483647, %v2125_v61  ;;  %v2140_v27 = vadd.f32 %v2090_v22, %v672_v9 }
 0x1c6   : > { %1715 = vpow2.f32 %v971_v59  ;;  %v849_v4 = vmul.f32 1.442695, %v839_v63  ;;  %v954_v5 = vand.u32 2147483647, %v2128_v0  ;;  %v969_v6 = vmul.f32 1.442695, %v959_v2 }
 0x1c7   : > { %v842_v7 = vsub.f32 0.0, %v834_v3  ;;  %v833_v8 = vand.u32 2147483647, %v2131_v1  ;;  %v953_v46 = vand.u32 2147483647, %v2140_v27 }
 0x1c8   : > { %1717 = vpow2.f32 %v849_v4  ;;  %v962_v10 = vsub.f32 0.0, %v954_v5  ;;  %v1503_v18 = vpop.f32.mrf.mxu1  ;;  %v1547_v19 = vpop.f32.mrf.mxu0  ;;  %v2468_v4 = vmax.f32 %v2117_v52, 0.0  ;;  %v2469_v52 = vmax.f32 %v2128_v0, 0.0 }
 0x1c9   : > { %1719 = vpow2.f32 %v969_v6  ;;  %v855_v11 = vmul.f32 1.442695, %v842_v7  ;;  %v841_v12 = vsub.f32 0.0, %v833_v8  ;;  %v2146_v35 = vadd.f32 %v1503_v18, %v2085_v21 }
 0x1ca   : > { %v975_v13 = vmul.f32 1.442695, %v962_v10  ;;  %v2149_v36 = vadd.f32 %v1547_v19, %v2090_v22  ;;  %v961_v8 = vsub.f32 0.0, %v953_v46 }
 0x1cb   : > { %1721 = vpow2.f32 %v855_v11  ;;  %v853_v17 = vmul.f32 1.442695, %v841_v12  ;;  %v836_v56 = vand.u32 2147483647, %v2146_v35 }
 0x1cc   : > { %v1706_v14 = vpop.eup %1705  ;;  %1723 = vpow2.f32 %v975_v13  ;;  %v956_v60 = vand.u32 2147483647, %v2149_v36 }
 0x1cd   : > { %v1708_v20 = vpop.eup %1707  ;;  %v870_v23 = vadd.f32 1.0, %v1706_v14  ;;  %1725 = vpow2.f32 %v853_v17  ;;  %v873_v38 = vmul.f32 -0.5, %v1706_v14  ;;  %v876_v48 = vand.u32 2147483647, %v1706_v14 }
 0x1ce   : > { %v990_v28 = vadd.f32 1.0, %v1708_v20  ;;  %v993_v39 = vmul.f32 -0.5, %v1708_v20  ;;  %v996_v59 = vand.u32 2147483647, %v1708_v20  ;;  %v964_v31 = vsub.f32 0.0, %v956_v60 }
 0x1cf   : > { %v1710_v33 = vpop.eup %1709  ;;  %1727 = vlog2.f32 %v870_v23  ;;  %v874_v57 = vadd.f32 1.0, %v873_v38  ;;  %vm2160_vm1 = vcmp.lt.f32.partialorder %v876_v48, 0.0004427343 }
 0x1d0   : > { %v1712_v37 = vpop.eup %1711  ;;  %1729 = vlog2.f32 %v990_v28  ;;  %v861_v40 = vadd.f32 1.0, %v1710_v33  ;;  %v864_v49 = vmul.f32 -0.5, %v1710_v33  ;;  %v994_v58 = vadd.f32 1.0, %v993_v39 }
 0x1d1   : > { %v981_v43 = vadd.f32 1.0, %v1712_v37  ;;  %v984_v50 = vmul.f32 -0.5, %v1712_v37  ;;  %v867_v62 = vand.u32 2147483647, %v1710_v33  ;;  %v987_v7 = vand.u32 2147483647, %v1712_v37 }
 0x1d2   : > { %v1714_v47 = vpop.eup %1713  ;;  %1731 = vlog2.f32 %v861_v40  ;;  %v865_v5 = vadd.f32 1.0, %v864_v49  ;;  %v875_v13 = vmul.f32 %v1706_v14, %v874_v57  ;;  %v995_v17 = vmul.f32 %v1708_v20, %v994_v58 }
 0x1d3   : > { %v2154_v51 = vpop.eup %1715  ;;  %1733 = vlog2.f32 %v981_v43  ;;  %v888_v54 = vadd.f32 1.0, %v1714_v47  ;;  %v891_v63 = vmul.f32 -0.5, %v1714_v47  ;;  %v985_v6 = vadd.f32 1.0, %v984_v50 }
 0x1d4   : > { %v1008_v2 = vadd.f32 1.0, %v2154_v51  ;;  %v1011_v10 = vmul.f32 -0.5, %v2154_v51  ;;  %vm2165_vm2 = vcmp.lt.f32.partialorder %v996_v59, 0.0004427343  ;;  %vm2171_vm3 = vcmp.lt.f32.partialorder %v867_v62, 0.0004427343 }
 0x1d5   : > { %1735 = vlog2.f32 %v888_v54  ;;  %v1718_v3 = vpop.eup %1717  ;;  %v892_v38 = vadd.f32 1.0, %v891_v63  ;;  %v894_v39 = vand.u32 2147483647, %v1714_v47  ;;  %vm2177_vm4 = vcmp.lt.f32.partialorder %v987_v7, 0.0004427343 }
 0x1d6   : > { %v1720_v9 = vpop.eup %1719  ;;  %1737 = vlog2.f32 %v1008_v2  ;;  %v879_v11 = vadd.f32 1.0, %v1718_v3  ;;  %v882_v12 = vmul.f32 -0.5, %v1718_v3  ;;  %v1014_v20 = vand.u32 2147483647, %v2154_v51 }
 0x1d7   : > { %v999_v19 = vadd.f32 1.0, %v1720_v9  ;;  %v1002_v40 = vmul.f32 -0.5, %v1720_v9  ;;  %v866_v49 = vmul.f32 %v1710_v33, %v865_v5  ;;  %v986_v50 = vmul.f32 %v1712_v37, %v985_v6 }
 0x1d8   : > { %v2169_v23 = vpop.eup %1721  ;;  %1739 = vlog2.f32 %v879_v11  ;;  %v1012_v54 = vadd.f32 1.0, %v1011_v10  ;;  %v883_v57 = vadd.f32 1.0, %v882_v12  ;;  %v885_v59 = vand.u32 2147483647, %v1718_v3 }
 0x1d9   : > { %v2175_v43 = vpop.eup %1723  ;;  %1741 = vlog2.f32 %v999_v19  ;;  %v906_v46 = vadd.f32 1.0, %v2169_v23  ;;  %v909_v62 = vmul.f32 -0.5, %v2169_v23  ;;  %v2187_v11 = vmul.f32 %v1714_v47, %v892_v38 }
 0x1da   : > { %v2183_v48 = vpop.eup %1725  ;;  %v1026_v63 = vadd.f32 1.0, %v2175_v43  ;;  %vm2189_vm5 = vcmp.lt.f32.partialorder %v894_v39, 0.0004427343  ;;  %v1003_v55 = vadd.f32 1.0, %v1002_v40  ;;  %v1005_v33 = vand.u32 2147483647, %v1720_v9 }
 0x1db   : > { %1743 = vlog2.f32 %v906_v46  ;;  %vm2197_vm6 = vcmp.lt.f32.partialorder %v1014_v20, 0.0004427343  ;;  %v1029_v6 = vmul.f32 -0.5, %v2175_v43  ;;  %v1013_v12 = vmul.f32 %v2154_v51, %v1012_v54 }
 0x1dc   : > { %v1728_v58 = vpop.eup %1727  ;;  %1745 = vlog2.f32 %v1026_v63  ;;  %v2205_v38 = vmul.f32 %v1718_v3, %v883_v57  ;;  %v897_v39 = vadd.f32 1.0, %v2183_v48  ;;  %v912_v63 = vand.u32 2147483647, %v2169_v23 }
 0x1dd   : > { %v1730_v2 = vpop.eup %1729  ;;  %v872_v7 = vmul.f32 0.6931472, %v1728_v58  ;;  %v910_v58 = vadd.f32 1.0, %v909_v62  ;;  %vm2213_vm7 = vcmp.lt.f32.partialorder %v885_v59, 0.0004427343  ;;  %v1004_v51 = vmul.f32 %v1720_v9, %v1003_v55  ;;  %v552_v9 = vpop.f32.mrf.mxu1 }
 0x1de   : > { %v992_v37 = vmul.f32 0.6931472, %v1730_v2  ;;  %vm2217_vm8 = vcmp.lt.f32.partialorder %v1005_v33, 0.0004427343  ;;  %v1030_v26 = vadd.f32 1.0, %v1029_v6  ;;  %1747 = vlog2.f32 %v897_v39 }
 0x1df   : > { %v1732_v10 = vpop.eup %1731  ;;  %v878_v47 = vsel %vm2160_vm1, %v875_v13, %v872_v7  ;;  %v2232_v25 = vmul.f32 %v2169_v23, %v910_v58  ;;  %vm2243_vm9 = vcmp.lt.f32.partialorder %v912_v63, 0.0004427343  ;;  %v979_v60 = vmul.f32 1.442695, %v964_v31  ;;  %v2273_v39 = vld [vmem:[%s2444_s4 + $0x2] ss:$0 sm:$0xff] }
 0x1e0   : > { %v1734_v40 = vpop.eup %1733  ;;  %v998_v20 = vsel %vm2165_vm2, %v995_v17, %v992_v37  ;;  %v863_v46 = vmul.f32 0.6931472, %v1732_v10  ;;  %v934_v17 = vadd.f32 %v878_v47, %v822_v15  ;;  %v1032_v15 = vand.u32 2147483647, %v2175_v43  ;;  %v682_v37 = vpop.f32.mrf.mxu0 }
 0x1e1   : > { %v1054_v2 = vadd.f32 %v998_v20, %v942_v16  ;;  %v983_v44 = vmul.f32 0.6931472, %v1734_v40  ;;  %v973_v16 = vmul.f32 1.442695, %v961_v8  ;;  %v1031_v47 = vmul.f32 %v2175_v43, %v1030_v26 }
 0x1e2   : > { %v1736_v13 = vpop.eup %1735  ;;  %v869_v18 = vsel %vm2171_vm3, %v866_v49, %v863_v46  ;;  %vm1033_vm10 = vcmp.lt.f32.partialorder %v1032_v15, 0.0004427343 }
 0x1e3   : > { %v2225_v54 = vadd.f32 0.0001, %v1054_v2  ;;  %v989_v57 = vsel %vm2177_vm4, %v986_v50, %v983_v44  ;;  %v890_v55 = vmul.f32 0.6931472, %v1736_v13  ;;  %v1738_v59 = vpop.eup %1737  ;;  %1749 = vpow2.f32 %v973_v16 }
 0x1e4   : > { %v1053_v62 = vadd.f32 %v989_v57, %v941_v29  ;;  %v933_v44 = vadd.f32 %v869_v18, %v821_v24  ;;  %v1010_v28 = vmul.f32 0.6931472, %v1738_v59  ;;  %v844_v29 = vsub.f32 0.0, %v836_v56 }
 0x1e5   : > { %v1110_v8 = vadd.f32 %v2225_v54, %v934_v17  ;;  %1150 = vst [vmem:[%s2237_s7 + $0x8] sm:$0xff] %v2225_v54  ;;  %v1740_v23 = vpop.eup %1739  ;;  %v896_v49 = vsel %vm2189_vm5, %v2187_v11, %v890_v55  ;;  %v2257_v24 = vadd.f32 %v2085_v21, %v552_v9  ;;  %v2288_v2 = vadd.f32 %v2090_v22, %v682_v37 }
 0x1e6   : > { %v2249_v14 = vadd.f32 0.0001, %v1053_v62  ;;  %v1742_v50 = vpop.eup %1741  ;;  %v1016_v7 = vsel %vm2197_vm6, %v1013_v12, %v1010_v28  ;;  %v881_v33 = vmul.f32 0.6931472, %v1740_v23  ;;  %v859_v56 = vmul.f32 1.442695, %v844_v29  ;;  %v1582_v12 = vpop.f32.mrf.mxu0 }
 0x1e7   : > { %1751 = vrcp.f32 %v1110_v8  ;;  %v1056_v11 = vadd.f32 %v1016_v7, %v944_v34  ;;  %v1001_v19 = vmul.f32 0.6931472, %v1742_v50  ;;  %v936_v21 = vadd.f32 %v896_v49, %v824_v30  ;;  %v1585_v34 = vpop.f32.mrf.mxu1 }
 0x1e8   : > { %v1109_v6 = vadd.f32 %v2249_v14, %v933_v44  ;;  %1149 = vst [vmem:[%s2237_s7] sm:$0xff] %v2249_v14  ;;  %v1744_v10 = vpop.eup %1743  ;;  %1753 = vpow2.f32 %v859_v56  ;;  %v835_v5 = vand.u32 2147483647, %v2257_v24  ;;  %v887_v41 = vsel %vm2213_vm7, %v2205_v38, %v881_v33  ;;  %v782_v57 = vpop.f32.mrf.mxu0 }
 0x1e9   : > { %v2275_v42 = vadd.f32 0.0001, %v1056_v11  ;;  %v1007_v30 = vsel %vm2217_vm8, %v1004_v51, %v1001_v19  ;;  %v1746_v43 = vpop.eup %1745  ;;  %v908_v20 = vmul.f32 0.6931472, %v1744_v10  ;;  %v788_v38 = vadd.f32 %v1582_v12, %v2273_v39  ;;  %v792_v18 = vpop.f32.mrf.mxu1 }
 0x1ea   : > { %1755 = vrcp.f32 %v1109_v6  ;;  %v1055_v40 = vadd.f32 %v1007_v30, %v943_v45  ;;  %v843_v46 = vsub.f32 0.0, %v835_v5  ;;  %v1028_v63 = vmul.f32 0.6931472, %v1746_v43 }
 0x1eb   : > { %1757 = vpow2.f32 %v979_v60  ;;  %v1112_v58 = vadd.f32 %v2275_v42, %v936_v21  ;;  %1152 = vst [vmem:[%s2237_s7 + $0x18] sm:$0xff] %v2275_v42  ;;  %v935_v51 = vadd.f32 %v887_v41, %v2468_v4  ;;  %v826_v45 = vmax.f32 %v2125_v61, 0.0  ;;  %v1748_v55 = vpop.eup %1747  ;;  %v1588_v44 = vpop.f32.mrf.mxu1 }
 0x1ec   : > { %v2293_v3 = vadd.f32 0.0001, %v1055_v40  ;;  %v857_v53 = vmul.f32 1.442695, %v843_v46  ;;  %v914_v13 = vsel %vm2243_vm9, %v2232_v25, %v908_v20  ;;  %v1034_v17 = vsel %vm1033_vm10, %v1031_v47, %v1028_v63 }
 0x1ed   : > { %1759 = vrcp.f32 %v1112_v58  ;;  %v1058_v26 = vadd.f32 %v1034_v17, %v2469_v52  ;;  %v798_v16 = vadd.f32 %v1585_v34, %v2273_v39  ;;  %v900_v61 = vmul.f32 -0.5, %v2183_v48  ;;  %v802_v60 = vpop.f32.mrf.mxu1 }
 0x1ee   : > { %v1111_v22 = vadd.f32 %v2293_v3, %v935_v51  ;;  %1151 = vst [vmem:[%s2237_s7 + $0x10] sm:$0xff] %v2293_v3  ;;  %1761 = vpow2.f32 %v857_v53  ;;  %v955_v9 = vand.u32 2147483647, %v2288_v2  ;;  %v1070_v59 = vsub.f32 0.0, %v788_v38 }
 0x1ef   : > { %v938_v25 = vadd.f32 %v914_v13, %v826_v45  ;;  %v2309_v15 = vadd.f32 0.0001, %v1058_v26  ;;  %v783_v8 = vadd.f32 %v2273_v39, %v782_v57  ;;  %v1072_v23 = vsub.f32 0.0, %v798_v16  ;;  %v1591_v4 = vpop.f32.mrf.mxu1 }
 0x1f0   : > { %v2307_v62 = vpop.eup %1749  ;;  %1763 = vrcp.f32 %v1111_v22  ;;  %v963_v32 = vsub.f32 0.0, %v955_v9  ;;  %v1079_v29 = vmul.f32 1.442695, %v1070_v59  ;;  %v901_v31 = vadd.f32 1.0, %v900_v61 }
 0x1f1   : > { %v1017_v0 = vadd.f32 1.0, %v2307_v62  ;;  %v1114_v28 = vadd.f32 %v2309_v15, %v938_v25  ;;  %1154 = vst [vmem:[%s2237_s7 + $0x28] sm:$0xff] %v2309_v15  ;;  %v793_v50 = vadd.f32 %v2273_v39, %v792_v18  ;;  %v903_v33 = vand.u32 2147483647, %v2183_v48 }
 0x1f2   : > { %v977_v56 = vmul.f32 1.442695, %v963_v32  ;;  %v899_v6 = vmul.f32 0.6931472, %v1748_v55  ;;  %v1069_v11 = vsub.f32 0.0, %v783_v8  ;;  %v808_v19 = vadd.f32 %v1588_v44, %v2273_v39  ;;  %v812_v55 = vpop.f32.mrf.mxu1 }
 0x1f3   : > { %1765 = vlog2.f32 %v1017_v0  ;;  %v1020_v47 = vmul.f32 -0.5, %v2307_v62  ;;  %v1083_v12 = vmul.f32 1.442695, %v1072_v23  ;;  %v902_v30 = vmul.f32 %v2183_v48, %v901_v31 }
 0x1f4   : > { %v1752_v49 = vpop.eup %1751  ;;  %1767 = vrcp.f32 %v1114_v28  ;;  %v1071_v34 = vsub.f32 0.0, %v793_v50  ;;  %vm2328_vm11 = vcmp.lt.f32.partialorder %v903_v33, 0.0004427343  ;;  %v1074_v20 = vsub.f32 0.0, %v808_v19 }
 0x1f5   : > { %v1126_v7 = vmul.f32 %v1752_v49, %v2225_v54  ;;  %v2319_v37 = vpop.eup %1753  ;;  %1769 = vpow2.f32 %v1079_v29  ;;  %v825_v58 = vmax.f32 %v2131_v1, 0.0  ;;  %v1077_v38 = vmul.f32 1.442695, %v1069_v11 }
 0x1f6   : > { %v924_v5 = vadd.f32 1.0, %v2319_v37  ;;  %1771 = vpow2.f32 %v977_v56  ;;  %v905_v48 = vsel %vm2328_vm11, %v902_v30, %v899_v6  ;;  %v1021_v51 = vadd.f32 1.0, %v1020_v47 }
 0x1f7   : > { %v1756_v10 = vpop.eup %1755  ;;  %v1134_v21 = vmax.f32 %v1126_v7, 1e-05  ;;  %v803_v53 = vadd.f32 %v2273_v39, %v802_v60  ;;  %v1081_v1 = vmul.f32 1.442695, %v1071_v34  ;;  %v945_v18 = vmax.f32 %v2140_v27, 0.0 }
 0x1f8   : > { %v2324_v54 = vpop.eup %1757  ;;  %v1125_v41 = vmul.f32 %v1756_v10, %v2249_v14  ;;  %1773 = vlog2.f32 %v924_v5  ;;  %v1087_v22 = vmul.f32 1.442695, %v1074_v20  ;;  %v937_v16 = vadd.f32 %v905_v48, %v825_v58 }
 0x1f9   : > { %v1142_v43 = vmin.f32 %v1134_v21, 0.99999  ;;  %v1044_v63 = vadd.f32 1.0, %v2324_v54  ;;  %1775 = vpow2.f32 %v1083_v12  ;;  %v1073_v57 = vsub.f32 0.0, %v803_v53 }
 0x1fa   : > { %v1133_v46 = vmax.f32 %v1125_v41, 1e-05  ;;  %v1760_v14 = vpop.eup %1759  ;;  %v1022_v9 = vmul.f32 %v2307_v62, %v1021_v51  ;;  %v1023_v59 = vand.u32 2147483647, %v2307_v62  ;;  %v818_v0 = vadd.f32 %v1591_v4, %v2273_v39 }
 0x1fb   : > { %1336 = vst [vmem:[%s2237_s7 + $0x48] sm:$0xff] %v1142_v43  ;;  %v2338_v45 = vpop.eup %1761  ;;  %v1128_v17 = vmul.f32 %v1760_v14, %v2275_v42  ;;  %1777 = vlog2.f32 %v1044_v63  ;;  %v1085_v27 = vmul.f32 1.442695, %v1073_v57  ;;  %v927_v28 = vmul.f32 -0.5, %v2319_v37 }
 0x1fc   : > { %v1141_v13 = vmin.f32 %v1133_v46, 0.99999  ;;  %1779 = vpow2.f32 %v1077_v38  ;;  %v915_v42 = vadd.f32 1.0, %v2338_v45  ;;  %v813_v32 = vadd.f32 %v2273_v39, %v812_v55 }
 0x1fd   : > { %v1764_v52 = vpop.eup %1763  ;;  %v1136_v26 = vmax.f32 %v1128_v17, 1e-05  ;;  %1781 = vpow2.f32 %v1081_v1  ;;  %v1047_v62 = vmul.f32 -0.5, %v2324_v54  ;;  %v1076_v23 = vsub.f32 0.0, %v818_v0 }
 0x1fe   : > { %1335 = vst [vmem:[%s2237_s7 + $0x40] sm:$0xff] %v1141_v13  ;;  %v1127_v61 = vmul.f32 %v1764_v52, %v2293_v3  ;;  %1783 = vpow2.f32 %v1087_v22  ;;  %vm1024_vm12 = vcmp.lt.f32.partialorder %v1023_v59, 0.0004427343  ;;  %v1075_v7 = vsub.f32 0.0, %v813_v32 }
 0x1ff   : > { %v1144_v25 = vmin.f32 %v1136_v26, 0.99999  ;;  %1785 = vpow2.f32 %v1085_v27  ;;  %v1091_v6 = vmul.f32 1.442695, %v1076_v23  ;;  %v930_v60 = vand.u32 2147483647, %v2319_v37 }
 0x200   : > { %v1766_v8 = vpop.eup %1765  ;;  %v1135_v44 = vmax.f32 %v1127_v61, 1e-05  ;;  %1787 = vlog2.f32 %v915_v42  ;;  %v1089_v10 = vmul.f32 1.442695, %v1075_v7  ;;  %v928_v47 = vadd.f32 1.0, %v927_v28 }
 0x201   : > { %v1768_v29 = vpop.eup %1767  ;;  %1338 = vst [vmem:[%s2237_s7 + $0x58] sm:$0xff] %v1144_v25  ;;  %v1019_v3 = vmul.f32 0.6931472, %v1766_v8  ;;  %v1048_v5 = vadd.f32 1.0, %v1047_v62  ;;  %v1050_v30 = vand.u32 2147483647, %v2324_v54 }
 0x202   : > { %v1770_v49 = vpop.eup %1769  ;;  %v1143_v31 = vmin.f32 %v1135_v44, 0.99999  ;;  %v1130_v50 = vmul.f32 %v1768_v29, %v2309_v15  ;;  %v929_v58 = vmul.f32 %v2319_v37, %v928_v47  ;;  %vm2367_vm13 = vcmp.lt.f32.partialorder %v930_v60, 0.0004427343 }
 0x203   : > { %v1025_v33 = vsel %vm1024_vm12, %v1022_v9, %v1019_v3  ;;  %v1094_v56 = vadd.f32 1.0, %v1770_v49  ;;  %v2353_v11 = vpop.eup %1771  ;;  %v1049_v38 = vmul.f32 %v2324_v54, %v1048_v5  ;;  %v948_v48 = vmax.f32 %v2149_v36, 0.0 }
 0x204   : > { %1337 = vst [vmem:[%s2237_s7 + $0x50] sm:$0xff] %v1143_v31  ;;  %v1138_v39 = vmax.f32 %v1130_v50, 1e-05  ;;  %v1057_v19 = vadd.f32 %v1025_v33, %v945_v18  ;;  %v1035_v15 = vadd.f32 1.0, %v2353_v11  ;;  %vm1051_vm14 = vcmp.lt.f32.partialorder %v1050_v30, 0.0004427343 }
 0x205   : > { %v1774_v21 = vpop.eup %1773  ;;  %1789 = vrcp.f32 %v1094_v56  ;;  %v828_v37 = vmax.f32 %v2146_v35, 0.0  ;;  %v918_v18 = vmul.f32 -0.5, %v2338_v45  ;;  %v1038_v22 = vmul.f32 -0.5, %v2353_v11 }
 0x206   : > { %v1146_v12 = vmin.f32 %v1138_v39, 0.99999  ;;  %v2358_v41 = vadd.f32 0.0001, %v1057_v19  ;;  %1791 = vpow2.f32 %v1091_v6  ;;  %v1776_v34 = vpop.eup %1775  ;;  %v926_v43 = vmul.f32 0.6931472, %v1774_v21 }
 0x207   : > { %1793 = vlog2.f32 %v1035_v15  ;;  %v1096_v46 = vadd.f32 1.0, %v1776_v34  ;;  %v919_v35 = vadd.f32 1.0, %v918_v18  ;;  %v1039_v59 = vadd.f32 1.0, %v1038_v22 }
 0x208   : > { %v1778_v40 = vpop.eup %1777  ;;  %1340 = vst [vmem:[%s2237_s7 + $0x68] sm:$0xff] %v1146_v12  ;;  %v1113_v20 = vadd.f32 %v2358_v41, %v937_v16  ;;  %1153 = vst [vmem:[%s2237_s7 + $0x20] sm:$0xff] %v2358_v41  ;;  %1795 = vpow2.f32 %v1089_v10  ;;  %v932_v51 = vsel %vm2367_vm13, %v929_v58, %v926_v43  ;;  %v921_v25 = vand.u32 2147483647, %v2338_v45 }
 0x209   : > { %v1046_v63 = vmul.f32 0.6931472, %v1778_v40  ;;  %v1780_v4 = vpop.eup %1779  ;;  %v940_v26 = vadd.f32 %v932_v51, %v828_v37  ;;  %v1041_v27 = vand.u32 2147483647, %v2353_v11  ;;  %v920_v29 = vmul.f32 %v2338_v45, %v919_v35 }
 0x20a   : > { %1797 = vrcp.f32 %v1113_v20  ;;  %v1093_v13 = vadd.f32 1.0, %v1780_v4  ;;  %v1782_v17 = vpop.eup %1781  ;;  %v947_v3 = vmax.f32 %v2288_v2, 0.0  ;;  %v1040_v23 = vmul.f32 %v2353_v11, %v1039_v59 }
 0x20b   : > { %v1052_v53 = vsel %vm1051_vm14, %v1049_v38, %v1046_v63  ;;  %1799 = vrcp.f32 %v1096_v46  ;;  %v1784_v1 = vpop.eup %1783  ;;  %v1095_v52 = vadd.f32 1.0, %v1782_v17  ;;  %vm922_vm15 = vcmp.lt.f32.partialorder %v921_v25, 0.0004427343 }
 0x20c   : > { %v1060_v54 = vadd.f32 %v1052_v53, %v948_v48  ;;  %1801 = vrcp.f32 %v1093_v13  ;;  %v1786_v36 = vpop.eup %1785  ;;  %v1098_v57 = vadd.f32 1.0, %v1784_v1  ;;  %vm1042_vm0 = vcmp.lt.f32.partialorder %v1041_v27, 0.0004427343 }
 0x20d   : > { %1803 = vrcp.f32 %v1095_v52  ;;  %v1097_v55 = vadd.f32 1.0, %v1786_v36  ;;  %v1788_v61 = vpop.eup %1787  ;;  %v827_v45 = vmax.f32 %v2257_v24, 0.0 }
 0x20e   : > { %v1068_v16 = vadd.f32 0.0001, %v1060_v54  ;;  %1805 = vrcp.f32 %v1098_v57  ;;  %v917_v8 = vmul.f32 0.6931472, %v1788_v61 }
 0x20f   : > { %1807 = vrcp.f32 %v1097_v55 }
 0x210   : > { %v1116_v9 = vadd.f32 %v1068_v16, %v940_v26  ;;  %1156 = vst [vmem:[%s2237_s7 + $0x38] sm:$0xff] %v1068_v16  ;;  %v923_v50 = vsel %vm922_vm15, %v920_v29, %v917_v8 }
 0x211   : > { %v939_v39 = vadd.f32 %v923_v50, %v827_v45 }
 0x212   : > { %v1790_v42 = vpop.eup %1789  ;;  %1809 = vrcp.f32 %v1116_v9 }
 0x213   : > { %v1792_v0 = vpop.eup %1791  ;;  %1344 = vst [vmem:[%s2237_s7 + $0x88] sm:$0xff] %v1790_v42 }
 0x214   : > { %v1794_v44 = vpop.eup %1793  ;;  %v1100_v28 = vadd.f32 1.0, %v1792_v0 }
 0x215   : > { %v1796_v32 = vpop.eup %1795  ;;  %v1037_v62 = vmul.f32 0.6931472, %v1794_v44 }
 0x216   : > { %1811 = vrcp.f32 %v1100_v28  ;;  %v1099_v49 = vadd.f32 1.0, %v1796_v32 }
 0x217   : > { %v1798_v31 = vpop.eup %1797  ;;  %v1043_v7 = vsel %vm1042_vm0, %v1040_v23, %v1037_v62 }
 0x218   : > { %v1800_v33 = vpop.eup %1799  ;;  %v1129_v56 = vmul.f32 %v1798_v31, %v2358_v41  ;;  %v1059_v2 = vadd.f32 %v1043_v7, %v947_v3  ;;  %1813 = vrcp.f32 %v1099_v49 }
 0x219   : > { %1346 = vst [vmem:[%s2237_s7 + $0x98] sm:$0xff] %v1800_v33  ;;  %v1802_v6 = vpop.eup %1801 }
 0x21a   : > { %v1137_v11 = vmax.f32 %v1129_v56, 1e-05  ;;  %v1067_v19 = vadd.f32 0.0001, %v1059_v2  ;;  %1343 = vst [vmem:[%s2237_s7 + $0x80] sm:$0xff] %v1802_v6  ;;  %v1804_v60 = vpop.eup %1803 }
 0x21b   : > { %v1806_v47 = vpop.eup %1805  ;;  %1345 = vst [vmem:[%s2237_s7 + $0x90] sm:$0xff] %v1804_v60 }
 0x21c   : > { %v1145_v10 = vmin.f32 %v1137_v11, 0.99999  ;;  %v1115_v21 = vadd.f32 %v1067_v19, %v939_v39  ;;  %1155 = vst [vmem:[%s2237_s7 + $0x30] sm:$0xff] %v1067_v19  ;;  %v1808_v24 = vpop.eup %1807  ;;  %1348 = vst [vmem:[%s2237_s7 + $0xa8] sm:$0xff] %v1806_v47 }
 0x21d   : > { %1347 = vst [vmem:[%s2237_s7 + $0xa0] sm:$0xff] %v1808_v24 }
 0x21e   : > { %1339 = vst [vmem:[%s2237_s7 + $0x60] sm:$0xff] %v1145_v10  ;;  %1815 = vrcp.f32 %v1115_v21 }
 0x21f   : > { %v1810_v5 = vpop.eup %1809 }
 0x220   : > { %v1132_v15 = vmul.f32 %v1810_v5, %v1068_v16 }
 0x222   : > { %v1140_v12 = vmax.f32 %v1132_v15, 1e-05 }
 0x223   : > { %v1812_v41 = vpop.eup %1811 }
 0x224   : > { %v1148_v30 = vmin.f32 %v1140_v12, 0.99999  ;;  %1350 = vst [vmem:[%s2237_s7 + $0xb8] sm:$0xff] %v1812_v41 }
 0x225   : > { %v1814_v34 = vpop.eup %1813 }
 0x226   : > { %1342 = vst [vmem:[%s2237_s7 + $0x78] sm:$0xff] %v1148_v30  ;;  %1349 = vst [vmem:[%s2237_s7 + $0xb0] sm:$0xff] %v1814_v34 }
 0x22b   : > { %v1816_v43 = vpop.eup %1815 }
 0x22c   : > { %v1131_v40 = vmul.f32 %v1816_v43, %v1067_v19 }
 0x22e   : > { %v1139_v20 = vmax.f32 %v1131_v40, 1e-05 }
 0x230   : > { %v1147_v46 = vmin.f32 %v1139_v20, 0.99999 }
 0x232   : > { %1341 = vst [vmem:[%s2237_s7 + $0x70] sm:$0xff] %v1147_v46 }
 0x233   : > { %s1355_s11 = sshll.u32 %s1889_s21, 10  ;;  %s1200_s12 = sshll.u32 %s2237_s7, 4  ;;  %s1201_s12 = int_to_ptr.vmem [resolvable:$true] %s1200_s12 }
 0x234   : > { %s1189_s15 = scalar_lea.hbm %s2445_s5, %s1355_s11  ;;  %s1902_s17 = smov 1024  }
 0x235   : > { %1629 = sst [smem:[#allocation7]] (%p1978_p4), %s1902_s17  ;;  %s1903_s16 = smov 2048  }
 0x236   : > { %1630 = sst [smem:[#allocation7 + $0x1]] (%p1978_p4), %s1903_s16  ;;  %s1904_s24 = smov 8  }
 0x237   : > { %1631 = sst [smem:[#allocation7 + $0x2]] (%p1978_p4), %s1904_s24  ;;  %s1905_s25 = smov 128  }
 0x238   : > { %1632 = sst [smem:[#allocation7 + $0x3]] (%p1978_p4), %s1905_s25  ;;  %s1906_s21 = smov 131072  }
 0x239   : > { %1633 = sst [smem:[#allocation7 + $0x4]] (%p1978_p4), %s1905_s25  ;;  %s1907_s27 = smov 0  }
 0x23a   : > { %1634 = sst [smem:[#allocation7 + $0x5]] (%p1978_p4), %s1904_s24 }
 0x23b   : > { %1635 = dma.general (%p1978_p4), %s1201_s12, 3072, %s1189_s15, %s1176_s10, %s1906_s21, [#allocation7], %s1907_s27, 0  }
 0x23c PF: > { %p1647_p10 = scmp.ge.s32.totalorder %s1897_s23, 2  ;;  %s1228_s29 = sand.u32 1, %s1877_s18  }
 0x23d   : > { %s1229_s7 = scalar_lea.sflag [#allocation4], %s1228_s29 }
 0x23e   : > { %p1642_p11 = pnand %p1647_p10, %p1985_p8 }
 0x240   : > { %p1643_p13 = pneg %p1642_p11 }
 0x242   : > { %1872 = dma.done.wait (%p1643_p13), %s1229_s7, 3072  }
 0x243   : > { %1874 = vsyncadd (%p1643_p13), %s1229_s7, 4294964224  ;;  %s19_s23 = sadd.s32 1, %s1897_s23   ;;  %s2474_s18 = smov %s1881_s19 }
 0x244   : > { %p16_p0 = scmp.ge.s32.totalorder %s19_s23, 4   ;;  %s2475_s19 = smov %s1885_s20 }
 0x245   : > { %s2476_s20 = smov %s1991_s6  ;;  %s2477_s21 = smov %s1893_s22 }
 0x246   : > { %s2478_s22 = smov %s2480_s26  ;;  %18 = sbr.rel (!%p16_p0) target bundleno = 5 (0x5), region = 95 }
 0x24b   :  { %1234 = vsyncpa [#allocation3], 1 }
 0x24c   :  { %1236 = vsyncpa [#allocation3 + $0x1], 1 }
 0x24d   :  { %1237 = vsyncpa [#allocation4], 1 }
 0x24e   :  { %1239 = vsyncpa [#allocation4 + $0x1], 1 }

</bundles_post_ra>
